<compile_context>
chip_gen: v7x
topology: tpu7x:2x2x1
jax: 0.10.0
libtpu: 0.0.40
codegen_flags: <defaults>
</compile_context>

<pallas_src>
import functools
import math

import jax
import jax.numpy as jnp
from jax import lax
from jax.experimental import pallas as pl
from jax.experimental.pallas import tpu as pltpu


def _special_tokens_kernel(last_idx_ref, x_ref, keep_ref, lang_ref, pad_ref,
                           eos_ref, o_ref, *, n_tokens, scale):
    """One (batch row, lane tile) grid step.

    Shapes seen by the kernel:
      last_idx_ref : (B,)  int32 in SMEM (scalar prefetch) — </s> position (T-space)
      x_ref        : (1, N, tD)   original token embeddings
      keep_ref     : (1, N, 1)    int32, nonzero => keep original embedding
      lang_ref     : (1, 1, tD)   <src_lang> embedding for this batch row
      pad_ref      : (1, 1, tD)   <pad> embedding
      eos_ref      : (1, 1, tD)   </s> embedding
      o_ref        : (1, T, tD)   T = N + 2
    """
    b = pl.program_id(0)
    li = last_idx_ref[b]                      # </s> position, always in [1, N+1]

    scale_f = jnp.float32(scale)
    out_dtype = o_ref.dtype

    x = x_ref[...].astype(jnp.float32)
    keep = keep_ref[...] != 0                 # (1, N, 1) bool
    lang = lang_ref[...].astype(jnp.float32)
    pad = pad_ref[...].astype(jnp.float32)
    eos = eos_ref[...].astype(jnp.float32)

    # Token region -> output rows 1..N (T-space position = token row index + 1).
    pos = lax.broadcasted_iota(jnp.int32, (1, n_tokens, 1), 1) + 1
    mid = jnp.where(keep, x, pad)             # padded positions -> <pad>
    mid = jnp.where(pos == li, eos, mid)      # </s> insertion inside token region
    o_ref[:, 1:n_tokens + 1, :] = (mid * scale_f).astype(out_dtype)

    # Row 0: <src_lang>  (</s> index is always >= 1, never lands here).
    o_ref[:, 0:1, :] = (lang * scale_f).astype(out_dtype)

    # Row N+1: appended <pad>, unless </s> lands on it.
    tail = jnp.where(li == n_tokens + 1, eos, pad)
    o_ref[:, n_tokens + 1:n_tokens + 2, :] = (tail * scale_f).astype(out_dtype)


def _pick_lane_tile(d, t_rows, itemsize, target_bytes=4 * 1024 * 1024):
    """Largest lane tile (multiple of 128, or full D) with a (T, tile) block <= budget."""
    if d % 128 != 0:
        return d                      # small / odd D: keep full lane extent
    td = d
    while t_rows * td * itemsize > target_bytes and td % 256 == 0:
        td //= 2
    return td


def special_tokens_embeddings_forward(x, encoder_padding_mask, src_langtoks,
                                      embedding_table, *, pad_idx=1, eos_idx=2,
                                      scale_embeddings=True):
    """JAX/Pallas equivalent of SpecialTokensEmbeddings.forward.

    Returns (x_out, mask_out) with shapes (B, N+2, D) and (B, N+2).
    """
    B, N, D = x.shape
    T = N + 2
    embed_scale = math.sqrt(D) if scale_embeddings else 1.0

    # ---- tiny glue in plain JAX: embedding-row lookups + mask bookkeeping ----
    lang_emb = embedding_table[src_langtoks[:, 0]].astype(x.dtype)[:, None, :]  # (B,1,D)
    pad_tok = embedding_table[pad_idx].astype(x.dtype)[None, None, :]           # (1,1,D)
    eos_tok = embedding_table[eos_idx].astype(x.dtype)[None, None, :]           # (1,1,D)

    mdt = encoder_padding_mask.dtype
    ones = jnp.ones((B, 1), mdt)
    mask_out = jnp.concatenate([ones, ones, encoder_padding_mask], axis=1)      # (B, T)

    # Index of last nonzero entry of mask_out (torch flip + argmax trick).
    last_idx = ((T - 1) - jnp.argmax(mask_out[:, ::-1] != 0, axis=1)).astype(jnp.int32)

    # Keep-mask over the token region, sublane-oriented so it broadcasts along D.
    keep = encoder_padding_mask.astype(jnp.int32)[:, :, None]                   # (B, N, 1)

    itemsize = jnp.dtype(x.dtype).itemsize
    tD = _pick_lane_tile(D, T, itemsize)
    n_d = D // tD

    kernel = functools.partial(_special_tokens_kernel, n_tokens=N, scale=embed_scale)

    cost = pl.CostEstimate(
        flops=2 * B * T * D,
        transcendentals=0,
        bytes_accessed=int(itemsize * (B * N * D + B * T * D + (B + 2) * D)
                           + 4 * B * (N + 1)),
    )

    grid_spec = pltpu.PrefetchScalarGridSpec(
        num_scalar_prefetch=1,                     # last_idx -> SMEM
        grid=(B, n_d),
        in_specs=[
            pl.BlockSpec((1, N, tD), lambda b, d, li: (b, 0, d)),   # x
            pl.BlockSpec((1, N, 1), lambda b, d, li: (b, 0, 0)),    # keep mask
            pl.BlockSpec((1, 1, tD), lambda b, d, li: (b, 0, d)),   # <src_lang>
            pl.BlockSpec((1, 1, tD), lambda b, d, li: (0, 0, d)),   # <pad>
            pl.BlockSpec((1, 1, tD), lambda b, d, li: (0, 0, d)),   # </s>
        ],
        out_specs=pl.BlockSpec((1, T, tD), lambda b, d, li: (b, 0, d)),
    )

    x_out = pl.pallas_call(
        kernel,
        out_shape=jax.ShapeDtypeStruct((B, T, D), x.dtype),
        grid_spec=grid_spec,
        compiler_params=pltpu.CompilerParams(
            dimension_semantics=("parallel", "parallel"),
            vmem_limit_bytes=48 * 1024 * 1024),
        cost_estimate=cost,
    )(last_idx, x, keep, lang_emb, pad_tok, eos_tok)

    return x_out, mask_out


def _reference_forward(x, mask, src_langtoks, table, *, pad_idx=1, eos_idx=2):
    """Pure-JAX reference mirroring the PyTorch module, for verification."""
    B, N, D = x.shape
    scale = math.sqrt(D)
    lang = table[src_langtoks[:, 0]][:, None, :]
    x1 = jnp.concatenate([lang, x], axis=1)                        # (B, N+1, D)
    m1 = jnp.concatenate([jnp.ones((B, 1), mask.dtype), mask], 1)  # (B, N+1)
    pad = table[pad_idx]
    eos = table[eos_idx]
    x1 = jnp.where((m1 == 0)[:, :, None], pad[None, None, :], x1)
    m2 = jnp.concatenate([jnp.ones((B, 1), mask.dtype), m1], 1)    # (B, N+2)
    T = N + 2
    last_idx = (T - 1) - jnp.argmax(m2[:, ::-1] != 0, axis=1)
    x2 = jnp.concatenate([x1, jnp.tile(pad[None, None, :], (B, 1, 1))], axis=1)
    ins = (jnp.arange(T)[None, :] == last_idx[:, None])[:, :, None]
    x2 = jnp.where(ins, eos[None, None, :], x2)
    return scale * x2, m2


if __name__ == "__main__":
    B, N, D = 2, 8, 32
    vocab_size = 16
    pad_idx, eos_idx = 1, 2

    key = jax.random.PRNGKey(0)
    k_table, k_x = jax.random.split(key)

    # deterministic "parameters": the nn.Embedding weight
    embedding_table = jax.random.normal(k_table, (vocab_size, D), jnp.float32)

    x = jax.random.normal(k_x, (B, N, D), jnp.float32)
    encoder_padding_mask = jnp.array(
        [[1, 1, 1, 1, 1, 1, 0, 0],
         [1, 1, 1, 1, 1, 0, 0, 0]], dtype=jnp.int32)
    src_langtoks = jnp.array([[5], [7]], dtype=jnp.int32)

    x_out, mask_out = special_tokens_embeddings_forward(
        x, encoder_padding_mask, src_langtoks, embedding_table,
        pad_idx=pad_idx, eos_idx=eos_idx, scale_embeddings=True)
    x_out = jax.block_until_ready(x_out)
    mask_out = jax.block_until_ready(mask_out)

    x_ref, m_ref = _reference_forward(
        x, encoder_padding_mask, src_langtoks, embedding_table,
        pad_idx=pad_idx, eos_idx=eos_idx)

    assert x_out.shape == (B, N + 2, D)
    assert mask_out.shape == (B, N + 2)
    assert jnp.allclose(x_out, x_ref, atol=1e-5, rtol=1e-5)
    assert jnp.array_equal(mask_out, m_ref)

    print("KERNEL_OK")
</pallas_src>

<mosaic_0001>
module attributes {stable_mosaic.version = 11 : i64} {
  func.func @_special_tokens_kernel(%arg0: i32, %arg1: i32, %arg2: memref<2xi32, #tpu.memory_space<smem>>, %arg3: memref<1x8x32xf32, #tpu.memory_space<vmem>>, %arg4: memref<1x8x1xi32, #tpu.memory_space<vmem>>, %arg5: memref<1x1x32xf32, #tpu.memory_space<vmem>>, %arg6: memref<1x1x32xf32, #tpu.memory_space<vmem>>, %arg7: memref<1x1x32xf32, #tpu.memory_space<vmem>>, %arg8: memref<1x10x32xf32, #tpu.memory_space<vmem>>) attributes {dimension_semantics = [#tpu.dimension_semantics<parallel>, #tpu.dimension_semantics<parallel>], iteration_bounds = array<i64: 2, 1>, scalar_prefetch = 1 : i64, scratch_operands = 0 : i64, tpu.core_type = #tpu.core_type<tc>, window_params = [{transform_indices = @transform_0, window_bounds = array<i64: 1, 8, 32>}, {transform_indices = @transform_1, window_bounds = array<i64: 1, 8, 1>}, {transform_indices = @transform_2, window_bounds = array<i64: 1, 1, 32>}, {transform_indices = @transform_3, window_bounds = array<i64: 1, 1, 32>}, {transform_indices = @transform_4, window_bounds = array<i64: 1, 1, 32>}, {transform_indices = @transform_5, window_bounds = array<i64: 1, 10, 32>}]} {
    %0 = arith.index_cast %arg0 : i32 to index
    %1 = memref.load %arg2[%0] : memref<2xi32, #tpu.memory_space<smem>>
    %c0 = arith.constant 0 : index
    %c0_0 = arith.constant 0 : index
    %c0_1 = arith.constant 0 : index
    %2 = vector.load %arg3[%c0, %c0_0, %c0_1] : memref<1x8x32xf32, #tpu.memory_space<vmem>>, vector<1x8x32xf32>
    %c0_2 = arith.constant 0 : index
    %c0_3 = arith.constant 0 : index
    %c0_4 = arith.constant 0 : index
    %3 = vector.load %arg4[%c0_2, %c0_3, %c0_4] : memref<1x8x1xi32, #tpu.memory_space<vmem>>, vector<1x8x1xi32>
    %c0_i32 = arith.constant 0 : i32
    %4 = vector.broadcast %c0_i32 : i32 to vector<1x8x1xi32>
    %5 = arith.cmpi ne, %3, %4 : vector<1x8x1xi32>
    %c0_5 = arith.constant 0 : index
    %c0_6 = arith.constant 0 : index
    %c0_7 = arith.constant 0 : index
    %6 = vector.load %arg5[%c0_5, %c0_6, %c0_7] : memref<1x1x32xf32, #tpu.memory_space<vmem>>, vector<1x1x32xf32>
    %c0_8 = arith.constant 0 : index
    %c0_9 = arith.constant 0 : index
    %c0_10 = arith.constant 0 : index
    %7 = vector.load %arg6[%c0_8, %c0_9, %c0_10] : memref<1x1x32xf32, #tpu.memory_space<vmem>>, vector<1x1x32xf32>
    %c0_11 = arith.constant 0 : index
    %c0_12 = arith.constant 0 : index
    %c0_13 = arith.constant 0 : index
    %8 = vector.load %arg7[%c0_11, %c0_12, %c0_13] : memref<1x1x32xf32, #tpu.memory_space<vmem>>, vector<1x1x32xf32>
    %9 = tpu.iota {dimensions = array<i32: 1>} : vector<1x8x1xi32>
    %c1_i32 = arith.constant 1 : i32
    %10 = vector.broadcast %c1_i32 : i32 to vector<1x8x1xi32>
    %11 = arith.addi %9, %10 : vector<1x8x1xi32>
    %12 = vector.shape_cast %5 : vector<1x8x1xi1> to vector<1x8x1xi1>
    %13 = vector.broadcast %12 : vector<1x8x1xi1> to vector<1x8x32xi1>
    %14 = vector.shape_cast %7 : vector<1x1x32xf32> to vector<1x1x32xf32>
    %15 = vector.broadcast %14 : vector<1x1x32xf32> to vector<1x8x32xf32>
    %16 = arith.select %13, %2, %15 : vector<1x8x32xi1>, vector<1x8x32xf32>
    %17 = vector.broadcast %1 : i32 to vector<1x8x1xi32>
    %18 = arith.cmpi eq, %11, %17 : vector<1x8x1xi32>
    %19 = vector.shape_cast %18 : vector<1x8x1xi1> to vector<1x8x1xi1>
    %20 = vector.broadcast %19 : vector<1x8x1xi1> to vector<1x8x32xi1>
    %21 = vector.shape_cast %8 : vector<1x1x32xf32> to vector<1x1x32xf32>
    %22 = vector.broadcast %21 : vector<1x1x32xf32> to vector<1x8x32xf32>
    %23 = arith.select %20, %22, %16 : vector<1x8x32xi1>, vector<1x8x32xf32>
    %cst = arith.constant 5.65685415 : f32
    %24 = vector.broadcast %cst : f32 to vector<1x8x32xf32>
    %25 = arith.mulf %23, %24 : vector<1x8x32xf32>
    %c0_14 = arith.constant 0 : index
    %c1 = arith.constant 1 : index
    %c0_15 = arith.constant 0 : index
    %26 = vector.load %arg8[%c0_14, %c1, %c0_15] : memref<1x10x32xf32, #tpu.memory_space<vmem>>, vector<1x8x32xf32>
    tpu.vector_store %arg8[%c0_14, %c1, %c0_15], %25 {strides = array<i32>} : memref<1x10x32xf32, #tpu.memory_space<vmem>>, vector<1x8x32xf32>,
    %cst_16 = arith.constant 5.65685415 : f32
    %27 = vector.broadcast %cst_16 : f32 to vector<1x1x32xf32>
    %28 = arith.mulf %6, %27 : vector<1x1x32xf32>
    %c0_17 = arith.constant 0 : index
    %c0_18 = arith.constant 0 : index
    %c0_19 = arith.constant 0 : index
    %29 = vector.load %arg8[%c0_17, %c0_18, %c0_19] : memref<1x10x32xf32, #tpu.memory_space<vmem>>, vector<1x1x32xf32>
    tpu.vector_store %arg8[%c0_17, %c0_18, %c0_19], %28 {strides = array<i32>} : memref<1x10x32xf32, #tpu.memory_space<vmem>>, vector<1x1x32xf32>,
    %c9_i32 = arith.constant 9 : i32
    %30 = arith.cmpi eq, %1, %c9_i32 : i32
    %31 = arith.select %30, %8, %7 : vector<1x1x32xf32>
    %cst_20 = arith.constant 5.65685415 : f32
    %32 = vector.broadcast %cst_20 : f32 to vector<1x1x32xf32>
    %33 = arith.mulf %31, %32 : vector<1x1x32xf32>
    %c0_21 = arith.constant 0 : index
    %c9 = arith.constant 9 : index
    %c0_22 = arith.constant 0 : index
    %34 = vector.load %arg8[%c0_21, %c9, %c0_22] : memref<1x10x32xf32, #tpu.memory_space<vmem>>, vector<1x1x32xf32>
    tpu.vector_store %arg8[%c0_21, %c9, %c0_22], %33 {strides = array<i32>} : memref<1x10x32xf32, #tpu.memory_space<vmem>>, vector<1x1x32xf32>,
    return
  }
  func.func @transform_0(%arg0: i32, %arg1: i32, %arg2: memref<2xi32, #tpu.memory_space<smem>>) -> (i32, i32, i32) {
    %c0_i32 = arith.constant 0 : i32
    %c0_i32_0 = arith.constant 0 : i32
    return %arg0, %c0_i32, %arg1 : i32, i32, i32
  }
  func.func @transform_1(%arg0: i32, %arg1: i32, %arg2: memref<2xi32, #tpu.memory_space<smem>>) -> (i32, i32, i32) {
    %c0_i32 = arith.constant 0 : i32
    %c0_i32_0 = arith.constant 0 : i32
    %c0_i32_1 = arith.constant 0 : i32
    return %arg0, %c0_i32, %c0_i32_0 : i32, i32, i32
  }
  func.func @transform_2(%arg0: i32, %arg1: i32, %arg2: memref<2xi32, #tpu.memory_space<smem>>) -> (i32, i32, i32) {
    %c0_i32 = arith.constant 0 : i32
    %c0_i32_0 = arith.constant 0 : i32
    return %arg0, %c0_i32, %arg1 : i32, i32, i32
  }
  func.func @transform_3(%arg0: i32, %arg1: i32, %arg2: memref<2xi32, #tpu.memory_space<smem>>) -> (i32, i32, i32) {
    %c0_i32 = arith.constant 0 : i32
    %c0_i32_0 = arith.constant 0 : i32
    %c0_i32_1 = arith.constant 0 : i32
    return %c0_i32, %c0_i32_0, %arg1 : i32, i32, i32
  }
  func.func @transform_4(%arg0: i32, %arg1: i32, %arg2: memref<2xi32, #tpu.memory_space<smem>>) -> (i32, i32, i32) {
    %c0_i32 = arith.constant 0 : i32
    %c0_i32_0 = arith.constant 0 : i32
    %c0_i32_1 = arith.constant 0 : i32
    return %c0_i32, %c0_i32_0, %arg1 : i32, i32, i32
  }
  func.func @transform_5(%arg0: i32, %arg1: i32, %arg2: memref<2xi32, #tpu.memory_space<smem>>) -> (i32, i32, i32) {
    %c0_i32 = arith.constant 0 : i32
    %c0_i32_0 = arith.constant 0 : i32
    return %arg0, %c0_i32, %arg1 : i32, i32, i32
  }
}

</mosaic_0001>

<bundles_post_ra>
// kernel: tpu_custom_call.1
= control target key start
LH: loop header
LB: loop body
LE: loop exit
PB: predicated region body
PF: predicated region fallthrough
CT: control target
= control target key end

     0   :  { %s675_s0 = inlined_call_operand.vmem [shape: s32[2], index: 0, kind: input, shape index: {}]   ;;  %s676_s1 = inlined_call_operand.vmem [shape: f32[2,8,32], index: 1, kind: input, shape index: {}]   ;;  %s677_s2 = inlined_call_operand.vmem [shape: s32[2,8,1], index: 2, kind: input, shape index: {}]   ;;  %s678_s3 = inlined_call_operand.vmem [shape: f32[2,1,32], index: 3, kind: input, shape index: {}]   ;;  %s679_s4 = inlined_call_operand.vmem [shape: f32[1,1,32], index: 4, kind: input, shape index: {}]   ;;  %s680_s5 = inlined_call_operand.vmem [shape: f32[1,1,32], index: 5, kind: input, shape index: {}]   ;;  %s681_s6 = inlined_call_operand.vmem [shape: f32[2,10,32], index: 6, kind: output, shape index: {}]  }
   0x1   :  { %s11_s23 = sshll.u32 %s675_s0, 4  ;;  %s12_s23 = int_to_ptr.vmem [resolvable:$true] %s11_s23 }
   0x2   :  { %s546_s24 = scalar_lea.vmem %s12_s23, 16  ;;  %p551_p1 = scmp.lt.s32.totalorder %s12_s23, %s12_s23 }
   0x3   :  { %p547_p0 = scmp.ne.s32.totalorder %s12_s23, %s546_s24  ;;  %p552_p2 = scmp.lt.s32.totalorder %s546_s24, %s546_s24 }
   0x5   :  { %p553_p3 = por %p552_p2, %p551_p1 }
   0x7   :  { %p554_p4 = pnand %p553_p3, %p547_p0 }
   0x9   :  { %557 = shalt.err (!%p554_p4)  }
   0xa   :  { %s584_s25 = smov [#allocation3]  }
   0xb   :  { %14 = dma.vmem_to_smem %s12_s23, 16, %s584_s25, [#allocation2] }
   0xc   :  { %570 = dma.done.wait [#allocation2], 16 }
   0xd   :  { %571 = vsyncadd [#allocation2], 4294967280 }
   0xe   :  { %16 = sfence }
   0xf   :  { %s624_s26 = smov 0   ;;  %s626_s27 = smov 0  }
  0x10   :  { %s628_s28 = smov 0  }
  0x11 LB: > { %s34_s0 = sadd.s32 1, %s578_s27  ;;  %p511_p5 = scmp.ge.s32.totalorder %s582_s28, 1  ;;  %s582_s28 = sphi %s628_s28, %s22_s28   ;;  %s578_s27 = sphi %s626_s27, %s683_s27   ;;  %s574_s26 = sphi %s624_s26, %s682_s26  }
  0x12   : > { %p36_p6 = scmp.ge.s32.totalorder %s34_s0, 2  ;;  %p250_p7 = scmp.lt.s32.totalorder %s582_s28, 3 }
  0x14   : > { %s685_s0 = smov (%p36_p6, %s34_s0), 0  ;;  %p251_p8 = pnand %p511_p5, %p250_p7 }
  0x15   : > { %p299_p9 = scmp.lt.s32.totalorder (!%p251_p8), %s574_s26, 1  ;;  %s642_s29 = sld [smem:[#allocation3 + %s574_s26]] (!%p251_p8)  ;;  %v585_v0 = vmov (!%p251_p8), 0   ;;  %vm367_vm0 = vcmask (!%p251_p8), 253952   ;;  %v335_v6 = vld [vmem:[%s679_s4] sm:$0x1] (!%p251_p8)  ;;  %v337_v10 = vlaneseq (!%p251_p8) }
  0x16   : > { %254 = sbr.rel (%p251_p8) target bundleno = 169 (0xa9), region = 40  ;;  %545 = vset.pattern.permute.xlu0 (!%p251_p8), %v585_v0  ;;  %v336_v7 = vld [vmem:[%s680_s5] sm:$0x1] (!%p251_p8)  ;;  %vm364_vm5 = vcmask (!%p251_p8), 261120  }
  0x17   : > { %v338_v11 = vshrl.u32 (!%p251_p8), %v337_v10, 7 }
  0x19   : > { %v348_v12 = vsub.s32 (!%p251_p8), 0, %v338_v11  ;;  %v339_v13 = vadd.s32 (!%p251_p8), 1, %v338_v11 }
  0x1b   : > { %p369_p10 = scmp.eq.s32.totalorder (!%p251_p8), %s642_s29, 9  ;;  %v352_v14 = vstv (!%p251_p8), %s642_s29  ;;  %v349_v15 = vrot.slane (!%p251_p8), %v335_v6, %v348_v12  ;;  %v360_v16 = vrot.slane (!%p251_p8), %v336_v7, %v348_v12 }
  0x1c   : > { %vm353_vm3 = vcmp.eq.s32.totalorder (!%p251_p8), %v339_v13, %v352_v14 }
  0x1d   : > { %s687_s26 = smov (!%p299_p9, %s574_s26), 1 }
  0x1e   : > { %s512_s30 = sshll.u32 %s687_s26, 3  ;;  %s315_s9 = scalar_lea.vmem %s678_s3, %s687_s26 }
  0x1f   : > { %s309_s12 = scalar_lea.vmem %s677_s2, %s512_s30  ;;  %v334_v1 = vld [vmem:[%s315_s9] sm:$0x1]  ;;  %s518_s13 = sshll.u32 %s687_s26, 4 }
  0x20   : > { %v332_v2 = vld [vmem:[%s309_s12] sm:$0xff]  ;;  %v366_v3 = vmul.f32 5.656854, %v334_v1  ;;  %s329_s16 = scalar_lea.vmem %s681_s6, %s518_s13  ;;  %s305_s24 = scalar_lea.vmem %s676_s1, %s512_s30 }
  0x21   : > { %vm333_vm1 = vcmp.ne.s32.totalorder %v332_v2, 0  ;;  %s370_s17 = scalar_select %p369_p10, 1, 0  ;;  %v331_v17 = vld [vmem:[%s305_s24] sm:$0xff] }
  0x22   : > { %v340_v4 = vsel %vm333_vm1, 1, %v585_v0  ;;  %368 = vst.msk [vmem:[%s329_s16] sm:$0x1] %vm367_vm0, %v366_v3 }
  0x23   : > { %342 = vperm.xlu0 %545, %v340_v4   ;;  %v371_v5 = vstv %s370_s17 }
  0x24   : > { %vm372_vm2 = vcmp.eq.s32.totalorder %v371_v5, 1 }
  0x25   : > { %v373_v8 = vsel %vm372_vm2, %v336_v7, %v335_v6 }
  0x26   : > { %v374_v9 = vmul.f32 5.656854, %v373_v8 }
  0x28   : > { %375 = vst.msk [vmem:[%s329_s16 + $0x9] sm:$0x1] %vm367_vm0, %v374_v9 }
  0xa2   : > { %v343_v18 = vpop.permute.xlu0 %342 }
  0xa3   : > { %vm344_vm4 = vcmp.eq.s32.totalorder %v343_v18, 1 }
  0xa4   : > { %v351_v19 = vsel %vm344_vm4, %v331_v17, %v349_v15 }
  0xa5   : > { %v362_v20 = vsel %vm353_vm3, %v360_v16, %v351_v19 }
  0xa6   : > { %v363_v21 = vmul.f32 5.656854, %v362_v20 }
  0xa8   : > { %365 = vst.msk [vmem:[%s329_s16 + $0x1] sm:$0xff] %vm364_vm5, %v363_v21 }
  0xa9 PF: > { %s22_s28 = sadd.s32 1, %s582_s28   ;;  %s682_s26 = smov %s578_s27 }
  0xaa   : > { %p19_p11 = scmp.ge.s32.totalorder %s22_s28, 4   ;;  %s683_s27 = smov %s685_s0 }
  0xac   :  { %21 = sbr.rel (!%p19_p11) target bundleno = 17 (0x11), region = 82 }

</bundles_post_ra>
